<compile_context>
chip_gen: v5e
topology: v5e:2x2
jax: 0.10.0
libtpu: 0.0.40
codegen_flags: <defaults>
</compile_context>

<pallas_src>
import functools

import jax
import jax.numpy as jnp
from jax import lax
from jax.experimental import pallas as pl
from jax.experimental.pallas import tpu as pltpu


def _vmem_capacity_bytes():
    try:
        return int(pltpu.get_tpu_info().vmem_capacity_bytes)
    except Exception:
        return 64 << 20            # conservative (v7x per-TC); v5e/v6e have 128 MiB


def _pick_spatial_tile(hw, bytes_per_col, budget, max_tile_cap=None):
    """Largest multiple-of-128 spatial tile fitting `budget`; pads hw if needed."""
    max_tile = max(128, (budget // max(1, bytes_per_col)) // 128 * 128)
    if max_tile_cap is not None:
        max_tile = max(128, min(max_tile, (max_tile_cap // 128) * 128))
    best = None
    t = 128
    while t <= min(hw, max_tile):
        if hw % t == 0:
            best = t
        t += 128
    if best is not None:
        return best, hw
    # No multiple-of-128 divisor of hw within budget: zero-pad the flattened
    # spatial dim instead of falling back to one giant (Cin, HW) block.
    t = min(max_tile, ((hw + 127) // 128) * 128)
    hw_pad = ((hw + t - 1) // t) * t
    return t, hw_pad


def _proj_kernel(x_ref, w_ref, b_ref, feat_ref):
    # inference path: projection head only (no emb_dict / label traffic at all)
    feat = jnp.dot(w_ref[...], x_ref[0],
                   preferred_element_type=jnp.float32) + b_ref[...]
    feat_ref[0] = feat.astype(feat_ref.dtype)


def _self_local_kernel(labels_ref,                      # SMEM (B,) int32 (scalar prefetch)
                       x_ref, w_ref, b_ref, *rest,
                       n_classes, normalize, inv_temp, pool_scale, hw_valid,
                       emit_logits, use_pmat, padded):
    rest = list(rest)
    pmat_ref = rest.pop(0) if use_pmat else None        # (S, PP, ts) f32, VMEM-resident
    emb_ref = rest.pop(0)                               # (Cemb, K_pad) compute dtype
    feat_ref = rest.pop(0)                              # (1, Cemb, ts)
    logits_ref = rest.pop(0) if emit_logits else None   # (1, PP, K_pad) f32
    loss_ref, pool_acc = rest                           # (1,1,1) f32 / (Cemb, PP) f32

    b = pl.program_id(0)
    s = pl.program_id(1)
    n_s = pl.num_programs(1)
    ts = x_ref.shape[2]

    # 1x1 conv == channels-first MXU matmul with f32 accumulation; feat block is
    # lane-dense (Cemb, ts) so the store path is unmasked.
    x = x_ref[0]                                         # (Cin, ts)
    feat = jnp.dot(w_ref[...], x, preferred_element_type=jnp.float32) + b_ref[...]
    feat_ref[0] = feat.astype(feat_ref.dtype)

    @pl.when(s == 0)
    def _():
        pool_acc[...] = jnp.zeros_like(pool_acc)

    # Adaptive-avg-pool partial sums over the conv output (1/(hb*wb) scale is
    # applied once, in f32, at finalize - exact for bf16 inputs).
    if use_pmat:
        pm = pmat_ref[s]                                 # (PP, ts), {0,1}; pad cols are 0
        pool_acc[...] += lax.dot_general(
            feat, pm, (((1,), (1,)), ((), ())),
            preferred_element_type=jnp.float32)          # (Cemb, PP)
    else:
        fsum = feat
        if padded:                                       # ignore zero-padded columns
            idx = s * ts + lax.broadcasted_iota(jnp.int32, (1, ts), 1)
            fsum = jnp.where(idx < hw_valid, fsum, 0.0)
        pool_acc[...] += jnp.sum(fsum, axis=1, keepdims=True)     # (Cemb, 1)

    @pl.when(s == n_s - 1)
    def _():
        pooled = pool_acc[...] * pool_scale              # (Cemb, PP) f32
        if normalize:   # 'COS': emb rows are pre-normalized in the wrapper
            pooled = pooled * lax.rsqrt(
                jnp.sum(pooled * pooled, axis=0, keepdims=True) + 1e-12)
        # lane-dense (PP, K_pad) logits; bf16 MXU when emb is bf16, f32 acc.
        logits = lax.dot_general(
            pooled.astype(emb_ref.dtype), emb_ref[...],
            (((0,), (0,)), ((), ())),
            preferred_element_type=jnp.float32) * inv_temp
        col = lax.broadcasted_iota(jnp.int32, logits.shape, 1)
        logits = jnp.where(col < n_classes, logits, -1e30)        # mask class padding
        if emit_logits:
            logits_ref[0] = logits
        # cross-entropy vs. this batch element's (patch-repeated) label
        lab = labels_ref[b]
        m = jnp.max(logits, axis=1, keepdims=True)
        lse = m + jnp.log(jnp.sum(jnp.exp(logits - m), axis=1, keepdims=True))
        correct = jnp.sum(jnp.where(col == lab, logits, 0.0), axis=1, keepdims=True)
        loss_ref[...] = jnp.sum(lse - correct).reshape(1, 1, 1)


def self_local_forward(latent, labels, emb_dict, conv_w, conv_b, *, patch=1,
                       method='DCL', temp=0.07, inference=False, out_pred=False,
                       max_spatial_tile=None):
    """Mirrors SelfLocalLayer.forward for the 'DCL' / 'DCL-COS' methods."""
    B, Cin, H, W = latent.shape
    Cemb = conv_w.shape[0]                   # conv weight (Cemb, Cin, 1, 1)
    P = patch
    assert H % P == 0 and W % P == 0
    PP = P * P
    HW = H * W
    hb, wb = H // P, W // P

    cdt = latent.dtype
    itemsize = jnp.dtype(cdt).itemsize
    K = int(emb_dict.shape[0]) if emb_dict is not None else 1
    K_pad = max(128, ((K + 127) // 128) * 128)           # lane-dense class dim
    hw128 = ((HW + 127) // 128) * 128

    # ---- generation-aware VMEM budgeting ---------------------------------
    vmem_cap = _vmem_capacity_bytes()
    # grid-invariant blocks are conservatively counted as double-buffered
    # (Mosaic may single-buffer revisited constant blocks, but don't rely on it).
    reserved = 2 * (Cemb * Cin + Cemb) * itemsize + Cemb * 128 * 4 + (4 << 20)
    if not inference:
        reserved += 2 * K_pad * Cemb * itemsize          # emb dictionary block
        reserved += 2 * max(PP, 8) * K_pad * 4           # logits out block
        if PP > 1:
            reserved += 2 * max(PP, 8) * hw128 * 4       # resident pooling mask
    # bigger streamed tiles on 128-MiB parts (v5e/v6e); tighter on v7x (64 MiB)
    stream_cap = (32 << 20) if vmem_cap >= (100 << 20) else (14 << 20)
    stream_budget = max(2 << 20, min(stream_cap, int(0.85 * vmem_cap) - reserved))
    per_col = 2 * (Cin + Cemb) * itemsize + 4 * Cemb     # dbl-buffered x/feat + f32 tmp
    ts, HW_pad = _pick_spatial_tile(HW, per_col, stream_budget, max_spatial_tile)
    S = HW_pad // ts
    vmem_limit = int(min(max(reserved + per_col * ts, 32 << 20),
                         int(0.85 * vmem_cap)))

    x3 = latent.reshape(B, Cin, HW)                      # NCHW kept; reshape is free
    if HW_pad > HW:
        x3 = jnp.pad(x3, ((0, 0), (0, 0), (0, HW_pad - HW)))
    w_mat = conv_w.reshape(Cemb, Cin).astype(cdt)
    b_col = conv_b.reshape(Cemb, 1).astype(jnp.float32)

    x_spec = pl.BlockSpec((1, Cin, ts), lambda b, s, *_: (b, 0, s))
    w_spec = pl.BlockSpec((Cemb, Cin), lambda b, s, *_: (0, 0))
    b_spec = pl.BlockSpec((Cemb, 1), lambda b, s, *_: (0, 0))
    feat_spec = pl.BlockSpec((1, Cemb, ts), lambda b, s, *_: (b, 0, s))

    if inference:
        feat = pl.pallas_call(
            _proj_kernel,
            grid_spec=pltpu.PrefetchScalarGridSpec(
                num_scalar_prefetch=0, grid=(B, S),
                in_specs=[x_spec, w_spec, b_spec], out_specs=feat_spec),
            out_shape=jax.ShapeDtypeStruct((B, Cemb, HW_pad), cdt),
            compiler_params=pltpu.CompilerParams(
                dimension_semantics=("parallel", "parallel"),
                vmem_limit_bytes=vmem_limit),
            cost_estimate=pl.CostEstimate(
                flops=int(2 * B * HW_pad * Cin * Cemb), transcendentals=0,
                bytes_accessed=int(B * HW_pad * (Cin + Cemb) * itemsize
                                   + (Cemb * Cin + Cemb) * itemsize)),
        )(x3, w_mat, b_col)
        if HW_pad > HW:
            feat = feat[:, :, :HW]
        return feat.reshape(B, Cemb, H, W)

    normalize = 'COS' in method
    inv_temp = float(1.0 / temp) if normalize else 1.0

    # dictionary: normalize (COS) in f32, then keep it in the compute dtype.
    emb = emb_dict.astype(jnp.float32)
    if normalize:
        emb = emb * lax.rsqrt(jnp.sum(emb * emb, axis=1, keepdims=True) + 1e-12)
    emb_t = jnp.zeros((Cemb, K_pad), jnp.float32).at[:, :K].set(emb.T).astype(cdt)

    in_specs = [x_spec, w_spec, b_spec]
    args = [x3, w_mat, b_col]
    if PP > 1:
        # {0,1} pooling mask (S, PP, ts): constant index_map -> DMA'd once and
        # VMEM-resident for the whole grid (no per-batch re-read of any pooling
        # matrix).  Pad columns are zero so they never contribute to the pool.
        hi = jnp.arange(H) // hb
        wi = jnp.arange(W) // wb
        pid = (hi[:, None] * P + wi[None, :]).reshape(HW)
        pm = jax.nn.one_hot(pid, PP, dtype=jnp.float32).T           # (PP, HW)
        if HW_pad > HW:
            pm = jnp.pad(pm, ((0, 0), (0, HW_pad - HW)))
        pm = pm.reshape(PP, S, ts).transpose(1, 0, 2)                # (S, PP, ts)
        in_specs.append(pl.BlockSpec((S, PP, ts), lambda b, s, *_: (0, 0, 0)))
        args.append(pm)
    in_specs.append(pl.BlockSpec((Cemb, K_pad), lambda b, s, *_: (0, 0)))
    args.append(emb_t)

    out_specs = [feat_spec]
    out_shapes = [jax.ShapeDtypeStruct((B, Cemb, HW_pad), cdt)]
    if out_pred:   # logits HBM stream only materialized when actually needed
        out_specs.append(pl.BlockSpec((1, PP, K_pad), lambda b, s, *_: (b, 0, 0)))
        out_shapes.append(jax.ShapeDtypeStruct((B, PP, K_pad), jnp.float32))
    out_specs.append(pl.BlockSpec((1, 1, 1), lambda b, s, *_: (b, 0, 0)))
    out_shapes.append(jax.ShapeDtypeStruct((B, 1, 1), jnp.float32))

    kernel = functools.partial(
        _self_local_kernel, n_classes=K, normalize=normalize, inv_temp=inv_temp,
        pool_scale=1.0 / float(hb * wb), hw_valid=HW, emit_logits=out_pred,
        use_pmat=(PP > 1), padded=(HW_pad > HW))

    pool_flops = 2 * B * HW_pad * Cemb * PP if PP > 1 else B * HW_pad * Cemb
    flops = int(2 * B * HW_pad * Cin * Cemb + pool_flops + 2 * B * PP * Cemb * K_pad)
    bytes_acc = int(B * HW_pad * (Cin + Cemb) * itemsize
                    + (Cemb * Cin + Cemb) * itemsize + Cemb * 4
                    + K_pad * Cemb * itemsize
                    + (max(PP, 8) * HW_pad * 4 if PP > 1 else 0)
                    + (B * PP * K_pad * 4 if out_pred else 0) + 8 * B)

    # TODO(synk): for B==1 on v7x, split the spatial axis across the two
    # TensorCores (core-parallel grid axis + per-core partial pool/loss) instead
    # of relying on batch-parallel megacore sharding.
    labels_i32 = labels.astype(jnp.int32)    # NOTE: labels are assumed to be < K
    outs = pl.pallas_call(
        kernel,
        grid_spec=pltpu.PrefetchScalarGridSpec(
            num_scalar_prefetch=1, grid=(B, S),
            in_specs=in_specs, out_specs=out_specs,
            scratch_shapes=[pltpu.VMEM((Cemb, PP), jnp.float32)]),
        out_shape=out_shapes,
        compiler_params=pltpu.CompilerParams(
            dimension_semantics=("parallel", "arbitrary"),
            vmem_limit_bytes=vmem_limit),
        cost_estimate=pl.CostEstimate(flops=flops,
                                      transcendentals=int(B * PP * K_pad),
                                      bytes_accessed=bytes_acc),
    )(labels_i32, *args)

    if out_pred:
        feat, logits_pad, loss_parts = outs
    else:
        feat, loss_parts = outs
        logits_pad = None

    if HW_pad > HW:
        feat = feat[:, :, :HW]
    x_out = feat.reshape(B, Cemb, H, W)
    loss = jnp.sum(loss_parts) / float(B * PP)
    loss_dict = {'dict_loss': loss}
    # TODO(synk): the 'FEAT' branch (SupConLoss) and the optim_step hook are not
    # defined in the reference snippet; only the 'DCL'/'DCL-COS' path is kernelized.
    if out_pred:
        logits = logits_pad.reshape(B * PP, K_pad)[:, :K]   # already lane-dense
        pred = jnp.argmax(logits, axis=1)
        return x_out, pred, loss, loss_dict
    return x_out, 0, loss, loss_dict


def _reference(latent, labels, emb_dict, conv_w, conv_b, patch, method, temp):
    """Pure-JAX reference of the same forward for a correctness check."""
    B, Cin, H, W = latent.shape
    Cemb = conv_w.shape[0]
    P = patch
    hp = jax.lax.Precision.HIGHEST
    x = jnp.einsum('bchw,oc->bohw', latent, conv_w.reshape(Cemb, Cin),
                   precision=hp) + conv_b[None, :, None, None]
    pooled = x.reshape(B, Cemb, P, H // P, P, W // P).mean(axis=(3, 5))
    pooled = pooled.transpose(0, 2, 3, 1).reshape(B * P * P, Cemb)
    emb = emb_dict
    if 'COS' in method:
        pooled = pooled / jnp.linalg.norm(pooled, axis=1, keepdims=True)
        emb = emb / jnp.linalg.norm(emb, axis=1, keepdims=True)
        t = temp
    else:
        t = 1.0
    logits = jnp.dot(pooled, emb.T, precision=hp) / t
    lab = jnp.repeat(labels, P * P)
    logp = jax.nn.log_softmax(logits, axis=-1)
    loss = -jnp.mean(logp[jnp.arange(lab.shape[0]), lab])
    return x, logits, loss


if __name__ == "__main__":
    key = jax.random.PRNGKey(0)
    k1, k2, k3, k4, k5, k6, k7 = jax.random.split(key, 7)

    B, Cin, H, W = 2, 4, 16, 16
    Cemb, K, temp = 32, 10, 0.07
    latent = jax.random.normal(k1, (B, Cin, H, W), jnp.float32)
    labels = jax.random.randint(k2, (B,), 0, K, jnp.int32)
    emb_dict = jax.random.normal(k3, (K, Cemb), jnp.float32)
    conv_w = 0.1 * jax.random.normal(k4, (Cemb, Cin, 1, 1), jnp.float32)
    conv_b = 0.01 * jax.random.normal(k5, (Cemb,), jnp.float32)

    def check(lat, lab, patch, method, **kw):
        x_out, pred, loss, _ = self_local_forward(
            lat, lab, emb_dict, conv_w, conv_b,
            patch=patch, method=method, temp=temp, out_pred=True, **kw)
        jax.block_until_ready((x_out, pred, loss))
        x_r, logits_r, loss_r = _reference(lat, lab, emb_dict, conv_w, conv_b,
                                           patch, method, temp)
        assert jnp.allclose(x_out, x_r, rtol=1e-4, atol=1e-4)
        assert jnp.allclose(loss, loss_r, rtol=1e-3, atol=1e-3)
        if 'COS' not in method:
            assert jnp.array_equal(pred, jnp.argmax(logits_r, axis=1))

    # patch=1 (sum-pool fast path) and patch=2 (VMEM-resident pooling mask)
    check(latent, labels, 1, 'DCL')
    check(latent, labels, 2, 'DCL')

    # multi-tile spatial accumulation (S>1) + cosine ('DCL-COS') variant
    latent32 = jax.random.normal(k6, (B, Cin, 32, 32), jnp.float32)
    check(latent32, labels, 2, 'DCL-COS', max_spatial_tile=256)

    # spatial size with no multiple-of-128 divisor -> zero-padded tile
    latent12 = jax.random.normal(k7, (B, Cin, 12, 12), jnp.float32)
    check(latent12, labels, 1, 'DCL')
    check(latent12, labels, 3, 'DCL')

    # training path without logits materialization + inference path
    x_tr, pred0, loss_tr, _ = self_local_forward(
        latent, labels, emb_dict, conv_w, conv_b, patch=1, method='DCL',
        temp=temp, out_pred=False)
    x_inf = self_local_forward(
        latent, labels, emb_dict, conv_w, conv_b, patch=1, method='DCL',
        temp=temp, inference=True)
    jax.block_until_ready((x_tr, loss_tr, x_inf))
    x_r, _, loss_r = _reference(latent, labels, emb_dict, conv_w, conv_b,
                                1, 'DCL', temp)
    assert pred0 == 0
    assert jnp.allclose(x_tr, x_r, rtol=1e-4, atol=1e-4)
    assert jnp.allclose(x_inf, x_r, rtol=1e-4, atol=1e-4)
    assert jnp.allclose(loss_tr, loss_r, rtol=1e-4, atol=1e-4)

    print("KERNEL_OK")
</pallas_src>

<mosaic_0001>
module attributes {stable_mosaic.version = 11 : i64} {
  func.func @_self_local_kernel(%arg0: i32, %arg1: i32, %arg2: memref<2xi32, #tpu.memory_space<smem>>, %arg3: memref<1x4x256xf32, #tpu.memory_space<vmem>>, %arg4: memref<32x4xf32, #tpu.memory_space<vmem>>, %arg5: memref<32x1xf32, #tpu.memory_space<vmem>>, %arg6: memref<32x128xf32, #tpu.memory_space<vmem>>, %arg7: memref<1x32x256xf32, #tpu.memory_space<vmem>>, %arg8: memref<1x1x128xf32, #tpu.memory_space<vmem>>, %arg9: memref<1x1x1xf32, #tpu.memory_space<vmem>>, %arg10: memref<32x1xf32, #tpu.memory_space<vmem>>) attributes {dimension_semantics = [#tpu.dimension_semantics<parallel>, #tpu.dimension_semantics<arbitrary>], iteration_bounds = array<i64: 2, 1>, scalar_prefetch = 1 : i64, scratch_operands = 1 : i64, tpu.core_type = #tpu.core_type<tc>, window_params = [{transform_indices = @transform_0, window_bounds = array<i64: 1, 4, 256>}, {pipeline_mode = #tpu.pipeline_mode<synchronous>, transform_indices = @transform_1, window_bounds = array<i64: 32, 4>}, {pipeline_mode = #tpu.pipeline_mode<synchronous>, transform_indices = @transform_2, window_bounds = array<i64: 32, 1>}, {pipeline_mode = #tpu.pipeline_mode<synchronous>, transform_indices = @transform_3, window_bounds = array<i64: 32, 128>}, {transform_indices = @transform_4, window_bounds = array<i64: 1, 32, 256>}, {transform_indices = @transform_5, window_bounds = array<i64: 1, 1, 128>}, {transform_indices = @transform_6, window_bounds = array<i64: 1, 1, 1>}]} {
    %c0 = arith.constant 0 : index
    %c0_0 = arith.constant 0 : index
    %c0_1 = arith.constant 0 : index
    %0 = vector.load %arg3[%c0, %c0_0, %c0_1] : memref<1x4x256xf32, #tpu.memory_space<vmem>>, vector<1x4x256xf32>
    %1 = vector.shape_cast %0 : vector<1x4x256xf32> to vector<4x256xf32>
    %c0_2 = arith.constant 0 : index
    %c0_3 = arith.constant 0 : index
    %2 = vector.load %arg4[%c0_2, %c0_3] : memref<32x4xf32, #tpu.memory_space<vmem>>, vector<32x4xf32>
    %cst = arith.constant dense<0.000000e+00> : vector<32x256xf32>
    %3 = tpu.matmul %2, %1, %cst {dimension_numbers = #tpu.dot_dimension_numbers<[1], [0], [0], [1], [0, 0, 1, 1], [], []>} : vector<32x4xf32>, vector<4x256xf32>, vector<32x256xf32> -> vector<32x256xf32>
    %c0_4 = arith.constant 0 : index
    %c0_5 = arith.constant 0 : index
    %4 = vector.load %arg5[%c0_4, %c0_5] : memref<32x1xf32, #tpu.memory_space<vmem>>, vector<32x1xf32>
    %5 = vector.broadcast %4 : vector<32x1xf32> to vector<32x256xf32>
    %6 = arith.addf %3, %5 : vector<32x256xf32>
    %c0_6 = arith.constant 0 : index
    %c0_7 = arith.constant 0 : index
    %c0_8 = arith.constant 0 : index
    %7 = vector.load %arg7[%c0_6, %c0_7, %c0_8] : memref<1x32x256xf32, #tpu.memory_space<vmem>>, vector<1x32x256xf32>
    %8 = vector.shape_cast %7 : vector<1x32x256xf32> to vector<32x256xf32>
    %9 = vector.shape_cast %6 : vector<32x256xf32> to vector<1x32x256xf32>
    tpu.vector_store %arg7[%c0_6, %c0_7, %c0_8], %9 {strides = array<i32>} : memref<1x32x256xf32, #tpu.memory_space<vmem>>, vector<1x32x256xf32>,
    %c0_i32 = arith.constant 0 : i32
    %10 = arith.cmpi eq, %arg1, %c0_i32 : i32
    %11 = arith.extui %10 : i1 to i32
    %c0_i32_9 = arith.constant 0 : i32
    %12 = arith.cmpi ne, %11, %c0_i32_9 : i32
    scf.if %12 {
      %cst_17 = arith.constant 0.000000e+00 : f32
      %21 = vector.broadcast %cst_17 : f32 to vector<32x1xf32>
      %c0_18 = arith.constant 0 : index
      %c0_19 = arith.constant 0 : index
      %22 = vector.load %arg10[%c0_18, %c0_19] : memref<32x1xf32, #tpu.memory_space<vmem>>, vector<32x1xf32>
      tpu.vector_store %arg10[%c0_18, %c0_19], %21 {strides = array<i32>} : memref<32x1xf32, #tpu.memory_space<vmem>>, vector<32x1xf32>,
    } else {
    }
    %c0_10 = arith.constant 0 : index
    %c0_11 = arith.constant 0 : index
    %13 = vector.load %arg10[%c0_10, %c0_11] : memref<32x1xf32, #tpu.memory_space<vmem>>, vector<32x1xf32>
    %cst_12 = arith.constant dense<0.000000e+00> : vector<32xf32>
    %14 = vector.multi_reduction <add>, %6, %cst_12 [1] : vector<32x256xf32> to vector<32xf32>
    %15 = vector.shape_cast %14 : vector<32xf32> to vector<32x1xf32>
    %16 = arith.addf %13, %15 : vector<32x1xf32>
    %c0_13 = arith.constant 0 : index
    %c0_14 = arith.constant 0 : index
    %17 = vector.load %arg10[%c0_13, %c0_14] : memref<32x1xf32, #tpu.memory_space<vmem>>, vector<32x1xf32>
    tpu.vector_store %arg10[%c0_13, %c0_14], %16 {strides = array<i32>} : memref<32x1xf32, #tpu.memory_space<vmem>>, vector<32x1xf32>,
    %c0_i32_15 = arith.constant 0 : i32
    %18 = arith.cmpi eq, %arg1, %c0_i32_15 : i32
    %19 = arith.extui %18 : i1 to i32
    %c0_i32_16 = arith.constant 0 : i32
    %20 = arith.cmpi ne, %19, %c0_i32_16 : i32
    scf.if %20 {
      %c0_17 = arith.constant 0 : index
      %c0_18 = arith.constant 0 : index
      %21 = vector.load %arg10[%c0_17, %c0_18] : memref<32x1xf32, #tpu.memory_space<vmem>>, vector<32x1xf32>
      %cst_19 = arith.constant 3.906250e-03 : f32
      %22 = vector.broadcast %cst_19 : f32 to vector<32x1xf32>
      %23 = arith.mulf %21, %22 : vector<32x1xf32>
      %c0_20 = arith.constant 0 : index
      %c0_21 = arith.constant 0 : index
      %24 = vector.load %arg6[%c0_20, %c0_21] : memref<32x128xf32, #tpu.memory_space<vmem>>, vector<32x128xf32>
      %cst_22 = arith.constant dense<0.000000e+00> : vector<1x128xf32>
      %25 = tpu.matmul %23, %24, %cst_22 {dimension_numbers = #tpu.dot_dimension_numbers<[0], [0], [1], [1], [0, 1, 1, 1], [], []>} : vector<32x1xf32>, vector<32x128xf32>, vector<1x128xf32> -> vector<1x128xf32>
      %cst_23 = arith.constant 1.000000e+00 : f32
      %26 = vector.broadcast %cst_23 : f32 to vector<1x128xf32>
      %27 = arith.mulf %25, %26 : vector<1x128xf32>
      %28 = tpu.iota {dimensions = array<i32: 1>} : vector<1x128xi32>
      %c10_i32 = arith.constant 10 : i32
      %29 = vector.broadcast %c10_i32 : i32 to vector<1x128xi32>
      %30 = arith.cmpi slt, %28, %29 : vector<1x128xi32>
      %cst_24 = arith.constant -1.000000e+30 : f32
      %31 = vector.broadcast %cst_24 : f32 to vector<1x128xf32>
      %32 = arith.select %30, %27, %31 : vector<1x128xi1>, vector<1x128xf32>
      %c0_25 = arith.constant 0 : index
      %c0_26 = arith.constant 0 : index
      %c0_27 = arith.constant 0 : index
      %33 = vector.load %arg8[%c0_25, %c0_26, %c0_27] : memref<1x1x128xf32, #tpu.memory_space<vmem>>, vector<1x1x128xf32>
      %34 = vector.shape_cast %33 : vector<1x1x128xf32> to vector<1x128xf32>
      %35 = vector.shape_cast %32 : vector<1x128xf32> to vector<1x1x128xf32>
      tpu.vector_store %arg8[%c0_25, %c0_26, %c0_27], %35 {strides = array<i32>} : memref<1x1x128xf32, #tpu.memory_space<vmem>>, vector<1x1x128xf32>,
      %36 = arith.index_cast %arg0 : i32 to index
      %37 = memref.load %arg2[%36] : memref<2xi32, #tpu.memory_space<smem>>
      %cst_28 = arith.constant dense<0xFF800000> : vector<1xf32>
      %38 = vector.multi_reduction <maximumf>, %32, %cst_28 [1] : vector<1x128xf32> to vector<1xf32>
      %39 = vector.shape_cast %38 : vector<1xf32> to vector<1x1xf32>
      %40 = vector.broadcast %39 : vector<1x1xf32> to vector<1x128xf32>
      %41 = arith.subf %32, %40 : vector<1x128xf32>
      %42 = math.exp %41 : vector<1x128xf32>
      %cst_29 = arith.constant dense<0.000000e+00> : vector<1xf32>
      %43 = vector.multi_reduction <add>, %42, %cst_29 [1] : vector<1x128xf32> to vector<1xf32>
      %44 = vector.shape_cast %43 : vector<1xf32> to vector<1x1xf32>
      %45 = math.log %44 : vector<1x1xf32>
      %46 = arith.addf %39, %45 : vector<1x1xf32>
      %47 = vector.broadcast %37 : i32 to vector<1x128xi32>
      %48 = arith.cmpi eq, %28, %47 : vector<1x128xi32>
      %cst_30 = arith.constant 0.000000e+00 : f32
      %49 = vector.broadcast %cst_30 : f32 to vector<1x128xf32>
      %50 = arith.select %48, %32, %49 : vector<1x128xi1>, vector<1x128xf32>
      %cst_31 = arith.constant dense<0.000000e+00> : vector<1xf32>
      %51 = vector.multi_reduction <add>, %50, %cst_31 [1] : vector<1x128xf32> to vector<1xf32>
      %52 = vector.shape_cast %51 : vector<1xf32> to vector<1x1xf32>
      %53 = arith.subf %46, %52 : vector<1x1xf32>
      %54 = vector.shape_cast %53 : vector<1x1xf32> to vector<1x1x1xf32>
      %cst_32 = arith.constant dense<0.000000e+00> : vector<1xf32>
      %55 = vector.multi_reduction <add>, %54, %cst_32 [1, 2] : vector<1x1x1xf32> to vector<1xf32>
      %56 = vector.shape_cast %55 : vector<1xf32> to vector<1x1x1xf32>
      %57 = vector.extract %56[0, 0, 0] : f32 from vector<1x1x1xf32>
      %58 = vector.broadcast %57 : f32 to vector<1x1x1xf32>
      %c0_33 = arith.constant 0 : index
      %c0_34 = arith.constant 0 : index
      %c0_35 = arith.constant 0 : index
      %59 = vector.load %arg9[%c0_33, %c0_34, %c0_35] : memref<1x1x1xf32, #tpu.memory_space<vmem>>, vector<1x1x1xf32>
      tpu.vector_store %arg9[%c0_33, %c0_34, %c0_35], %58 {strides = array<i32>} : memref<1x1x1xf32, #tpu.memory_space<vmem>>, vector<1x1x1xf32>,
    } else {
    }
    return
  }
  func.func @transform_0(%arg0: i32, %arg1: i32, %arg2: memref<2xi32, #tpu.memory_space<smem>>) -> (i32, i32, i32) {
    %c0_i32 = arith.constant 0 : i32
    %c0_i32_0 = arith.constant 0 : i32
    return %arg0, %c0_i32, %arg1 : i32, i32, i32
  }
  func.func @transform_1(%arg0: i32, %arg1: i32, %arg2: memref<2xi32, #tpu.memory_space<smem>>) -> (i32, i32) {
    %c0_i32 = arith.constant 0 : i32
    %c0_i32_0 = arith.constant 0 : i32
    %c0_i32_1 = arith.constant 0 : i32
    return %c0_i32, %c0_i32_0 : i32, i32
  }
  func.func @transform_2(%arg0: i32, %arg1: i32, %arg2: memref<2xi32, #tpu.memory_space<smem>>) -> (i32, i32) {
    %c0_i32 = arith.constant 0 : i32
    %c0_i32_0 = arith.constant 0 : i32
    %c0_i32_1 = arith.constant 0 : i32
    return %c0_i32, %c0_i32_0 : i32, i32
  }
  func.func @transform_3(%arg0: i32, %arg1: i32, %arg2: memref<2xi32, #tpu.memory_space<smem>>) -> (i32, i32) {
    %c0_i32 = arith.constant 0 : i32
    %c0_i32_0 = arith.constant 0 : i32
    %c0_i32_1 = arith.constant 0 : i32
    return %c0_i32, %c0_i32_0 : i32, i32
  }
  func.func @transform_4(%arg0: i32, %arg1: i32, %arg2: memref<2xi32, #tpu.memory_space<smem>>) -> (i32, i32, i32) {
    %c0_i32 = arith.constant 0 : i32
    %c0_i32_0 = arith.constant 0 : i32
    return %arg0, %c0_i32, %arg1 : i32, i32, i32
  }
  func.func @transform_5(%arg0: i32, %arg1: i32, %arg2: memref<2xi32, #tpu.memory_space<smem>>) -> (i32, i32, i32) {
    %c0_i32 = arith.constant 0 : i32
    %c0_i32_0 = arith.constant 0 : i32
    %c0_i32_1 = arith.constant 0 : i32
    return %arg0, %c0_i32, %c0_i32_0 : i32, i32, i32
  }
  func.func @transform_6(%arg0: i32, %arg1: i32, %arg2: memref<2xi32, #tpu.memory_space<smem>>) -> (i32, i32, i32) {
    %c0_i32 = arith.constant 0 : i32
    %c0_i32_0 = arith.constant 0 : i32
    %c0_i32_1 = arith.constant 0 : i32
    return %arg0, %c0_i32, %c0_i32_0 : i32, i32, i32
  }
}

</mosaic_0001>

<bundles_post_ra>
// kernel: tpu_custom_call.1
= control target key start
LH: loop header
LB: loop body
LE: loop exit
PB: predicated region body
PF: predicated region fallthrough
CT: control target
= control target key end

     0   :  { %s955_s27 = smov [#allocation4]   ;;  %s1198_s0 = inlined_call_operand.vmem [shape: s32[2], index: 0, kind: input, shape index: {}]   ;;  %s1199_s1 = inlined_call_operand.vmem [shape: f32[2,4,256], index: 1, kind: input, shape index: {}]   ;;  %s1200_s2 = inlined_call_operand.vmem [shape: f32[32,4], index: 2, kind: input, shape index: {}]   ;;  %s1201_s3 = inlined_call_operand.vmem [shape: f32[32,1], index: 3, kind: input, shape index: {}]   ;;  %s1202_s4 = inlined_call_operand.vmem [shape: f32[32,128], index: 4, kind: input, shape index: {}]   ;;  %s1203_s5 = inlined_call_operand.hbm [shape: f32[2,32,256], index: 5, kind: output, shape index: {0}]   ;;  %s1204_s6 = inlined_call_operand.hbm [shape: f32[2,1,128], index: 6, kind: output, shape index: {1}]   ;;  %s1205_s7 = inlined_call_operand.vmem [shape: f32[2,1,1], index: 7, kind: output, shape index: {2}]  }
   0x1   :  { %1207 = sst [smem:[#allocation12_spill]] %s1199_s1  ;;  %s14_s26 = sshll.u32 %s1198_s0, 4  ;;  %s15_s26 = int_to_ptr.vmem [resolvable:$true] %s14_s26 }
   0x2   :  { %1208 = sst [smem:[#allocation13_spill]] %s1200_s2 }
   0x3   :  { %1209 = sst [smem:[#allocation14_spill]] %s1201_s3 }
   0x4   :  { %1210 = sst [smem:[#allocation15_spill]] %s1202_s4 }
   0x5   :  { %17 = dma.vmem_to_smem %s15_s26, 16, %s955_s27, [#allocation3] }
   0x6   :  { %921 = dma.done.wait [#allocation3], 16 }
   0x7   :  { %922 = vsyncadd [#allocation3], 4294967280 }
   0x8   :  { %20 = sfence }
   0x9   :  { %21 = vsyncpa [#allocation6], 0 }
   0xa   :  { %23 = vsyncpa [#allocation6 + $0x1], 0 }
   0xb   :  { %24 = vsyncpa [#allocation8], 0 }
   0xc   :  { %26 = vsyncpa [#allocation8 + $0x1], 0  ;;  %s1003_s28 = smov 0   ;;  %s1005_s29 = smov 0  }
   0xd   :  { %s1007_s30 = smov 0   ;;  %s1009_s8 = smov 0  }
   0xe   :  { %s1011_s9 = smov 0   ;;  %s1013_s0 = smov 0  }
   0xf LB: > { %s728_s10 = sadd.s32 4294967295, %s953_s0   ;;  %s729_s11 = sadd.s32 4294967294, %s953_s0   ;;  %s953_s0 = sphi %s1013_s0, %s32_s0   ;;  %s949_s9 = sphi %s1011_s9, %s1222_s9   ;;  %s945_s8 = sphi %s1009_s8, %s1221_s8   ;;  %s941_s30 = sphi %s1007_s30, %s1220_s30   ;;  %s937_s29 = sphi %s1005_s29, %s1219_s29   ;;  %s933_s28 = sphi %s1003_s28, %s1218_s28  }
  0x10   : > { %s44_s12 = sadd.s32 1, %s949_s9  ;;  %s144_s13 = sadd.s32 1, %s941_s30 }
  0x11   : > { %p46_p0 = scmp.ge.s32.totalorder %s44_s12, 2  ;;  %p154_p1 = scmp.ne.s32.totalorder %s941_s30, %s937_s29 }
  0x12   : > { %p155_p2 = scmp.eq.s32.totalorder %s728_s10, 1  ;;  %p160_p3 = scmp.ne.s32.totalorder %s937_s29, %s933_s28 }
  0x13   : > { %s1224_s12 = smov (%p46_p0, %s44_s12), 0  ;;  %p161_p5 = scmp.eq.s32.totalorder %s729_s11, 1 }
  0x14   : > { %p1043_p4 = por %p155_p2, %p154_p1  ;;  %s139_s15 = ssub.s32 %s949_s9, %s1224_s12 }
  0x15   : > { %p732_p6 = scmp.ge.s32.totalorder %s953_s0, 1  ;;  %p142_p7 = scmp.eq.s32.totalorder %s139_s15, 0 }
  0x16   : > { %p1050_p8 = por %p161_p5, %p160_p3  ;;  %p253_p9 = scmp.lt.s32.totalorder %s953_s0, 3 }
  0x17   : > { %s1056_s17 = scalar_select %p142_p7, %s941_s30, %s144_s13  }
  0x18   : > { %p254_p10 = pnand %p732_p6, %p253_p9 }
  0x19   : > { %p295_p11 = scmp.lt.s32.totalorder (!%p254_p10), %s945_s8, 1  ;;  %s1213_s3 = sld [smem:[#allocation14_spill]] (!%p254_p10) }
  0x1a   : > { %257 = sbr.rel (%p254_p10) target bundleno = 915 (0x393), region = 36  ;;  %s1214_s1 = sld [smem:[#allocation12_spill]] (!%p254_p10) }
  0x1b   : > { %s1215_s2 = sld [smem:[#allocation13_spill]] (!%p254_p10)  ;;  %s597_s21 = scalar_lea.hbm (!%p254_p10), %s1204_s6, %s945_s8 }
  0x1c   : > { %s1216_s4 = sld [smem:[#allocation15_spill]] (!%p254_p10) }
  0x1d   : > { %s535_s24 = sld [smem:[#allocation4 + %s945_s8]] (!%p254_p10) }
  0x1f   : > { %v956_v0 = vmov 0   ;;  %v313_v1 = vld [vmem:[%s1213_s3] sm:$0xff]  ;;  %s1063_s20 = scalar_select %p295_p11, %s945_s8, 1  ;;  %v315_v2 = vld [vmem:[%s1213_s3 + $0x10] sm:$0xff]  ;;  %v314_v4 = vld [vmem:[%s1213_s3 + $0x8] sm:$0xff]  ;;  %vm354_vm0 = vcmask 1043456   ;;  %v530_v62 = vlaneseq }
  0x20   : > { %823 = vset.pattern.permute.xlu0 %v956_v0  ;;  %824 = vset.pattern.permute.xlu1 %v956_v0  ;;  %v316_v5 = vld [vmem:[%s1213_s3 + $0x18] sm:$0xff]  ;;  %vm341_vm1 = vcmask 31744   ;;  %vm429_vm2 = vcmask 7168   ;;  %v957_v13 = vmov 0.0   ;;  %vm506_vm3 = vcmask 261120  }
  0x21   : > { %319 = vperm.xlu0 %823, %v313_v1   ;;  %329 = vperm.xlu1 %824, %v315_v2   ;;  %s752_s23 = sshll.u32 %s1063_s20, 3  ;;  %v309_v6 = vld [vmem:[%s1215_s2] sm:$0xff]  ;;  %v310_v7 = vld [vmem:[%s1215_s2 + $0x8] sm:$0xff]  ;;  %v311_v10 = vld [vmem:[%s1215_s2 + $0x10] sm:$0xff]  ;;  %431 = vst.msk [vmem:[#allocation2 + $0x8] sm:$0xff] %vm429_vm2, %v957_v13  ;;  %v531_v63 = vand.u32 127, %v530_v62 }
  0x22   : > { %s302_s26 = scalar_lea.vmem %s1214_s1, %s752_s23  ;;  %v312_v11 = vld [vmem:[%s1215_s2 + $0x18] sm:$0xff]  ;;  %430 = vst.msk [vmem:[#allocation2] sm:$0xff] %vm429_vm2, %v957_v13  ;;  %v472_v47 = vld [vmem:[%s1216_s4 + $0x10] sm:$0xff]  ;;  %v471_v49 = vld [vmem:[%s1216_s4 + $0x8] sm:$0xff]  ;;  %vm536_vm5 = vcmask 1040384  }
  0x23   : > { %v308_v3 = vld [vmem:[%s302_s26] sm:$0xff]  ;;  %s1099_s26 = sand.u32 1, %s937_s29   ;;  %432 = vst.msk [vmem:[#allocation2 + $0x10] sm:$0xff] %vm429_vm2, %v957_v13  ;;  %v473_v46 = vld [vmem:[%s1216_s4 + $0x18] sm:$0xff]  ;;  %vm532_vm4 = vcmp.lt.s32.totalorder %v531_v63, 10  ;;  %v549_v2 = vstv %s535_s24 }
  0x24   : > { %338 = vst [vmem:[#allocation1] ss:$2 sm:$0xff] %v308_v3  ;;  %s733_s27 = sshll.u32 %s1099_s26, 6  ;;  %522 = vmatpush.msra.mxu2 %v473_v46  ;;  %v470_v52 = vld [vmem:[%s1216_s4] sm:$0xff]  ;;  %s1206_s25 = scalar_lea.vmem [#allocation7], %s1099_s26  ;;  %vm550_vm6 = vcmp.eq.s32.totalorder %v531_v63, %v549_v2 }
  0x25   : > { %433 = vst.msk [vmem:[#allocation2 + $0x18] sm:$0xff] %vm429_vm2, %v957_v13  ;;  %s1106_s10 = scalar_lea.vmem [#allocation5], %s733_s27  ;;  %s753_s27 = sshll.u32 %s945_s8, 6 }
  0x26   : > { %523 = vmatpush.msra.mxu2 %v472_v47  ;;  %s582_s15 = scalar_lea.hbm %s1203_s5, %s753_s27  ;;  %s583_s22 = sshll.u32 %s1106_s10, 4  ;;  %s584_s22 = int_to_ptr.vmem [resolvable:$true] %s583_s22 }
  0x27   : > { %s585_s23 = sshll.u32 %s582_s15, 4  ;;  %s562_s24 = scalar_lea.sflag [#allocation6], %s1099_s26  ;;  %s586_s23 = int_to_ptr.hbm [resolvable:$true] %s585_s23 }
  0x28   : > { %v435_v37 = vld [vmem:[#allocation2 + $0x8] sm:$0xff]  ;;  %524 = vmatpush.msra.mxu2 %v471_v49  ;;  %s861_s27 = scalar_lea.hbm %s1203_s5, 128 }
  0x29   : > { %324 = vperm.xlu0 %823, %v314_v4   ;;  %334 = vperm.xlu1 %824, %v316_v5   ;;  %v434_v40 = vld [vmem:[#allocation2] sm:$0xff] }
  0x2a   : > { %v436_v41 = vld [vmem:[#allocation2 + $0x10] sm:$0xff]  ;;  %525 = vmatpush.msra.mxu2 %v470_v52 }
  0x2b   : > { %v339_v8 = vld.sshfl [vmem:[#allocation1] sm:$0xff pattern:$0x75316420]  ;;  %v340_v9 = vld.sshfl [vmem:[#allocation1 + $0x8] sm:$0xff pattern:$0x75316420] }
  0x2c   : > { %736 = vmatpush.msk.msra.mxu0 %vm354_vm0, %v339_v8  ;;  %754 = vmatpush.msk.msra.mxu3 %vm354_vm0, %v339_v8  ;;  %v437_v48 = vld [vmem:[#allocation2 + $0x18] sm:$0xff] }
  0x2d   : > { %755 = vmatpush.msk.msra.mxu1 %vm354_vm0, %v340_v9  ;;  %737 = vmatmul.msk.f32.vlgmr.msra.gmra.mxu0 %vm341_vm1, %v309_v6 }
  0x2e   : > { %738 = vmatmul.msk.f32.vlgmr.msra.gmra.mxu3 %vm341_vm1, %v310_v7  ;;  %743 = vmatmul.msk.f32.vlgmr.msra.gmra.mxu1 %vm341_vm1, %v310_v7 }
  0x2f   : > { %741 = vmatpush.msk.msrb.mxu0 %vm354_vm0, %v340_v9 }
  0x35   : > { %742 = vmatmul.msk.f32.vlgmr.msrb.gmra.mxu0 %vm341_vm1, %v309_v6 }
  0x36   : > { %739 = vmatmul.msk.f32.gmra.mxu3 %vm341_vm1, %v311_v10  ;;  %744 = vmatmul.msk.f32.gmra.mxu1 %vm341_vm1, %v311_v10 }
  0x3e   : > { %740 = vmatmul.msk.f32.gmra.mxu3 %vm341_vm1, %v312_v11  ;;  %745 = vmatmul.msk.f32.gmra.mxu1 %vm341_vm1, %v312_v11 }
  0x93   : > { %v320_v12 = vpop.permute.xlu0 %319  ;;  %v330_v19 = vpop.permute.xlu1 %329 }
  0x9b   : > { %v325_v15 = vpop.permute.xlu0 %324  ;;  %v335_v28 = vpop.permute.xlu1 %334 }
  0xaa   : > { %v376_v14 = vpop.f32.mrf.mxu0 }
  0xab   : > { %v377_v16 = vadd.f32 %v376_v14, %v320_v12  ;;  %v408_v17 = vpop.f32.mrf.mxu1 }
  0xac   : > { %v409_v18 = vadd.f32 %v408_v17, %v325_v15 }
  0xad   : > { %417 = vst [vmem:[%s1106_s10] sm:$0xff] %v377_v16 }
  0xae   : > { %420 = vst [vmem:[%s1106_s10 + $0x18] sm:$0xff] %v409_v18 }
  0xb1   : > { %v379_v20 = vpop.f32.mrf.mxu3 }
  0xb2   : > { %v380_v21 = vadd.f32 %v379_v20, %v325_v15  ;;  %v405_v22 = vpop.f32.mrf.mxu0 }
  0xb3   : > { %v406_v23 = vadd.f32 %v405_v22, %v320_v12  ;;  %v411_v24 = vpop.f32.mrf.mxu1 }
  0xb4   : > { %419 = vst [vmem:[%s1106_s10 + $0x10] sm:$0xff] %v380_v21  ;;  %v441_v25 = vadd.f32 %v409_v18, %v380_v21  ;;  %v412_v26 = vadd.f32 %v411_v24, %v330_v19 }
  0xb5   : > { %418 = vst [vmem:[%s1106_s10 + $0x8] sm:$0xff] %v406_v23  ;;  %v438_v31 = vadd.f32 %v406_v23, %v377_v16 }
  0xb6   : > { %442 = vadd.xlane.f32.xlu2 %v441_v25  ;;  %422 = vst [vmem:[%s1106_s10 + $0x28] sm:$0xff] %v412_v26 }
  0xb9   : > { %v382_v27 = vpop.f32.mrf.mxu3 }
  0xba   : > { %v383_v29 = vadd.f32 %v382_v27, %v330_v19 }
  0xbb   : > { %v414_v30 = vpop.f32.mrf.mxu1 }
  0xbc   : > { %421 = vst [vmem:[%s1106_s10 + $0x20] sm:$0xff] %v383_v29  ;;  %v415_v32 = vadd.f32 %v414_v30, %v335_v28  ;;  %v444_v33 = vadd.f32 %v412_v26, %v383_v29 }
  0xbe   : > { %439 = vadd.xlane.f32.xlu2 %v438_v31  ;;  %424 = vst [vmem:[%s1106_s10 + $0x38] sm:$0xff] %v415_v32  ;;  %445 = vadd.xlane.f32.xlu0 %v444_v33 }
  0xc1   : > { %v385_v34 = vpop.f32.mrf.mxu3 }
  0xc2   : > { %v386_v35 = vadd.f32 %v385_v34, %v335_v28 }
  0xc4   : > { %423 = vst [vmem:[%s1106_s10 + $0x30] sm:$0xff] %v386_v35  ;;  %v447_v36 = vadd.f32 %v415_v32, %v386_v35 }
  0xc6   : > { %448 = vadd.xlane.f32.xlu1 %v447_v36 }
 0x129   : > { %v443_v38 = vpop.xlane.xlu2 %442 }
 0x12a   : > { %v451_v39 = vadd.f32 %v443_v38, %v435_v37 }
 0x12c   : > { %456 = vst.msk [vmem:[#allocation2 + $0x8] sm:$0xff] %vm429_vm2, %v451_v39 }
 0x131   : > { %v440_v42 = vpop.xlane.xlu2 %439  ;;  %v446_v43 = vpop.xlane.xlu0 %445 }
 0x132   : > { %v450_v44 = vadd.f32 %v440_v42, %v434_v40  ;;  %v452_v45 = vadd.f32 %v446_v43, %v436_v41 }
 0x133   : > { %v463_v55 = vld [vmem:[#allocation2 + $0x8] sm:$0xff] }
 0x134   : > { %455 = vst.msk [vmem:[#allocation2] sm:$0xff] %vm429_vm2, %v450_v44  ;;  %v467_v56 = vmul.f32 0.00390625, %v463_v55 }
 0x135   : > { %457 = vst.msk [vmem:[#allocation2 + $0x10] sm:$0xff] %vm429_vm2, %v452_v45 }
 0x139   : > { %v449_v50 = vpop.xlane.xlu1 %448 }
 0x13a   : > { %v453_v51 = vadd.f32 %v449_v50, %v437_v48 }
 0x13b   : > { %v462_v53 = vld [vmem:[#allocation2] sm:$0xff] }
 0x13c   : > { %v466_v54 = vmul.f32 0.00390625, %v462_v53  ;;  %458 = vst.msk [vmem:[#allocation2 + $0x18] sm:$0xff] %vm429_vm2, %v453_v51  ;;  %v464_v57 = vld [vmem:[#allocation2 + $0x10] sm:$0xff] }
 0x13d   : > { %v468_v58 = vmul.f32 0.00390625, %v464_v57 }
 0x13e   : > { %474 = vxpose.xlu2.b32.start [1/4] (short) (narrow) %v466_v54, 8 }
 0x143   : > { %v465_v59 = vld [vmem:[#allocation2 + $0x18] sm:$0xff] }
 0x144   : > { %v469_v60 = vmul.f32 0.00390625, %v465_v59 }
 0x146   : > { %475 = vxpose.xlu2.b32.cont [2/4] (short) (narrow) %v467_v56, 8 }
 0x14e   : > { %476 = vxpose.xlu2.b32.cont [3/4] (short) (narrow) %v468_v58, 8 }
 0x156   : > { %477 = vxpose.xlu2.b32.end [4/4] (short) (narrow) %v469_v60, 8 }
 0x1d7   : > { %v490_v61 = vpop.trf.xlu2 }
 0x1d8   : > { %746 = vmatmul.msk.f32.vlgmr.msra.gmra.mxu2 %vm506_vm3, %v490_v61 }
 0x25b   : > { %v527_v0 = vpop.f32.mrf.mxu2 }
 0x25c   : > { %v533_v1 = vsel %vm532_vm4, %v527_v0, -1e+30 }
 0x25d   : > { %v537_v3 = vsel %vm536_vm5, %v533_v1, -inf  ;;  %534 = vst [vmem:[%s1206_s25] sm:$0x1] %v533_v1  ;;  %v551_v4 = vsel %vm550_vm6, %v533_v1, 0.0  ;;  %s855_s25 = sshra.s32 %s586_s23, 4  ;;  %s856_s25 = int_to_ptr.hbm [resolvable:$true] %s855_s25 }
 0x25e   : > { %538 = vmax.xlane.f32.xlu0 %v537_v3  ;;  %v552_v5 = vsel %vm536_vm5, %v551_v4, 0.0  ;;  %s857_s1 = scalar_lea.hbm %s856_s25, 64  ;;  %p862_p1 = scmp.lt.s32.totalorder %s856_s25, %s1203_s5 }
 0x25f   : > { %p858_p12 = scmp.ne.s32.totalorder %s856_s25, %s857_s1  ;;  %p863_p2 = scmp.lt.s32.totalorder %s861_s27, %s857_s1 }
 0x261   : > { %p859_p13 = pnand %p858_p12, %p1043_p4  ;;  %p864_p3 = por %p863_p2, %p862_p1 }
 0x263   : > { %p860_p0 = pneg %p859_p13 }
 0x265   : > { %p865_p5 = pnand %p864_p3, %p860_p0 }
 0x266   : > { %553 = vadd.xlane.f32.xlu0 %v552_v5 }
 0x2d1   : > { %v539_v6 = vpop.xlane.xlu0 %538 }
 0x2d2   : > { %v540_v7 = vsub.f32 %v533_v1, %v539_v6 }
 0x2d4   : > { %v541_v8 = vmul.f32 1.442695, %v540_v7 }
 0x2d6   : > { %825 = vpow2.f32 %v541_v8 }
 0x2dc   : > { %v826_v9 = vpop.eup %825 }
 0x2dd   : > { %v543_v10 = vsel %vm536_vm5, %v826_v9, 0.0 }
 0x2de   : > { %544 = vadd.xlane.f32.xlu1 %v543_v10 }
 0x2df   : > { %868 = shalt.err (!%p865_p5)
}
 0x2e0   : > { %s958_s8 = smov 256   ;;  %s959_s10 = smov 16  }
 0x2e1   : > { %758 = dma.vmem_to_hbm [thread:$0]  (%p1043_p4), %s584_s22, 1024, %s586_s23, %s562_s24, %s958_s8, %s958_s8, %s959_s10  }
 0x2e2   : > { %s1217_s15 = scalar_lea.vmem [#allocation7], %s1099_s26  ;;  %s601_s2 = sshll.u32 %s597_s21, 4  ;;  %s602_s2 = int_to_ptr.hbm [resolvable:$true] %s601_s2 }
 0x2e3   : > { %s599_s18 = sshll.u32 %s1217_s15, 4  ;;  %s567_s3 = scalar_lea.sflag [#allocation8], %s1099_s26  ;;  %s600_s18 = int_to_ptr.vmem [resolvable:$true] %s599_s18 }
 0x2e4   : > { %s883_s19 = sshra.s32 %s602_s2, 4  ;;  %s889_s11 = scalar_lea.hbm %s1204_s6, 2  ;;  %s884_s19 = int_to_ptr.hbm [resolvable:$true] %s883_s19 }
 0x2e5   : > { %s885_s1 = scalar_lea.hbm %s884_s19, 1  ;;  %p890_p10 = scmp.lt.s32.totalorder %s884_s19, %s1204_s6 }
 0x2e6   : > { %p886_p6 = scmp.ne.s32.totalorder %s884_s19, %s885_s1  ;;  %p891_p11 = scmp.lt.s32.totalorder %s889_s11, %s885_s1 }
 0x2e8   : > { %p887_p7 = pnand %p886_p6, %p1043_p4  ;;  %p892_p12 = por %p891_p11, %p890_p10 }
 0x2ea   : > { %p888_p9 = pneg %p887_p7 }
 0x2ec   : > { %p893_p13 = pnand %p892_p12, %p888_p9 }
 0x2ee   : > { %896 = shalt.err (!%p893_p13)
}
 0x2ef   : > { %759 = dma.vmem_to_hbm [thread:$0]  (%p1043_p4), %s600_s18, 16, %s602_s2, %s567_s3   ;;  %v554_v15 = vpop.xlane.xlu0 %553  ;;  %vm559_vm7 = vcmask 0  }
 0x2f0   : > { %s307_s4 = scalar_lea.vmem %s1205_s7, %s1063_s20 }
 0x351   : > { %v545_v11 = vpop.xlane.xlu1 %544 }
 0x352   : > { %827 = vlog2.f32 %v545_v11 }
 0x358   : > { %v828_v12 = vpop.eup %827 }
 0x359   : > { %v547_v13 = vmul.f32 0.6931472, %v828_v12 }
 0x35b   : > { %v548_v14 = vadd.f32 %v547_v13, %v539_v6 }
 0x35d   : > { %v555_v16 = vsub.f32 %v548_v14, %v554_v15 }
 0x35f   : > { %756 = vpush %v555_v16 }
 0x390   : > { %s757_s22 = spop %756 }
 0x391   : > { %v558_v17 = vstv %s757_s22 }
 0x392   : > { %560 = vst.msk [vmem:[%s307_s4] sm:$0x1] %vm559_vm7, %v558_v17 }
 0x393 PF: > { %p769_p4 = scmp.ge.s32.totalorder %s953_s0, 2  ;;  %s616_s14 = sand.u32 1, %s933_s28  }
 0x394   : > { %s617_s23 = scalar_lea.sflag [#allocation6], %s616_s14 }
 0x395   : > { %p763_p0 = pnand %p769_p4, %p1050_p8 }
 0x397   : > { %p764_p1 = pneg %p763_p0 }
 0x399   : > { %924 = dma.done.wait (%p764_p1), %s617_s23, 1024  }
 0x39a   : > { %926 = vsyncadd (%p764_p1), %s617_s23, 4294966272  ;;  %s627_s24 = scalar_lea.sflag [#allocation8], %s616_s14 }
 0x39b   : > { %928 = dma.done.wait (%p764_p1), %s627_s24, 16  }
 0x39c   : > { %930 = vsyncadd (%p764_p1), %s627_s24, 4294967280  ;;  %s32_s0 = sadd.s32 1, %s953_s0   ;;  %s1218_s28 = smov %s937_s29 }
 0x39d   : > { %p29_p2 = scmp.ge.s32.totalorder %s32_s0, 4   ;;  %s1219_s29 = smov %s941_s30 }
 0x39e   : > { %s1220_s30 = smov %s1056_s17  ;;  %s1221_s8 = smov %s949_s9 }
 0x39f   : > { %s1222_s9 = smov %s1224_s12  ;;  %31 = sbr.rel (!%p29_p2) target bundleno = 15 (0xf), region = 108 }
 0x3a4   :  { %638 = vsyncpa [#allocation6], 1 }
 0x3a5   :  { %640 = vsyncpa [#allocation6 + $0x1], 1 }
 0x3a6   :  { %641 = vsyncpa [#allocation8], 1 }
 0x3a7   :  { %643 = vsyncpa [#allocation8 + $0x1], 1 }

</bundles_post_ra>
